<compile_context>
chip_gen: v5e
topology: v5e:2x2
jax: 0.10.0
libtpu: 0.0.40
codegen_flags: <defaults>
</compile_context>

<pallas_src>
import numpy as np
import jax
import jax.numpy as jnp
from jax.experimental import pallas as pl
from jax.experimental.pallas import tpu as pltpu

# ---- model hyper-parameters (small, consistent with CaserConfig) ----
B = 2                      # batch
L = 8                      # config.max_length
H = 32                     # config.hidden_size
NV = 4                     # config.num_vertical
NH = 4                     # config.num_horizontal
F_IN = NV * H + NH * L     # fc input features (160)
CONV_N = NV * H + L * L * NH   # fused conv matmul output width (128 + 256 = 384)
OUT_PAD = 128              # fc output padded to a full 128-lane register
NEG = -1e30                # "bias" for invalid sliding positions (killed by ReLU)


def caser_kernel(x_ref, wc_ref, wf_ref, b_ref, out_ref):
    """Whole-batch Caser forward in one invocation (no grid).

    Refs (all f32, whole arrays resident in VMEM):
      x_ref  : (B, L*H)          inputs_embeds flattened per batch row
      wc_ref : (L*H, CONV_N)     fused conv weight: cols 0..NV*H-1 = kron(wv.T, I_H)
                                 (vertical conv), cols NV*H.. = block-Toeplitz horizontal
                                 conv weights (col = t*(L*NH) + (i-1)*NH + c)
      wf_ref : (F_IN, 128)       fc weight (wf.T) with output dim padded to 128 lanes
      b_ref  : (1, CONV_N+128)   packed biases: [bv repeated over H | bh per (t,i,c) column,
                                 NEG where t+i > L | fc bias padded to 128]
      out_ref: (B, 128)          fc output (lane-dense store; wrapper slices [:, :H])
    """
    # ---- ALL convs (vertical + every horizontal window size/offset/channel) in ONE matmul ----
    s = jnp.dot(x_ref[...], wc_ref[...],
                preferred_element_type=jnp.float32) + b_ref[:, :CONV_N]      # (B, 384)

    # vertical features: adaptive_max_pool2d to (1, H) is the identity here (height already 1)
    vfeat = s[:, :NV * H]                                                    # (B, 128)

    # horizontal: conv_act = ReLU; invalid sliding positions carry a -1e30 bias -> ReLU -> 0,
    # which is safe for the subsequent max-pool because all valid ReLU outputs are >= 0.
    h = jnp.maximum(s[:, NV * H:], 0.0)                                      # (B, L*L*NH)

    # ---- max_pool1d over the L sliding positions (static lane-group reduce) ----
    hfeat = h[:, :L * NH]                                                    # (B, 32)
    for t in range(1, L):
        hfeat = jnp.maximum(hfeat, h[:, t * (L * NH):(t + 1) * (L * NH)])

    # ---- dropout: inference mode => identity; fc (single matmul) + ReLU ----
    feat = jnp.concatenate([vfeat, hfeat], axis=-1)                          # (B, F_IN)
    out = jnp.dot(feat, wf_ref[...],
                  preferred_element_type=jnp.float32) + b_ref[:, CONV_N:]    # (B, 128)
    out_ref[...] = jnp.maximum(out, 0.0)      # single unmasked (B, 128) store


def caser_forward(x, packed):
    """x: (B, L, H) inputs_embeds -> (B, H) hidden state."""
    w_conv, w_fc, b_pack = packed
    x_flat = x.reshape(B, L * H)                                             # free view

    vmem = lambda: pl.BlockSpec(memory_space=pltpu.MemorySpace.VMEM)
    out = pl.pallas_call(
        caser_kernel,
        out_shape=jax.ShapeDtypeStruct((B, OUT_PAD), jnp.float32),
        in_specs=[vmem(), vmem(), vmem(), vmem()],
        out_specs=vmem(),
    )(x_flat, w_conv, w_fc, b_pack)
    # TODO(synk): for a real (large) batch, add a batch grid axis with
    # dimension_semantics=("parallel",) to use both v7x TensorCores.
    return out[:, :H]


def make_params(key):
    """Canonical (PyTorch-layout) parameters."""
    ks = jax.random.split(key, 6)
    scale = 0.1
    wv = scale * jax.random.normal(ks[0], (NV, L), jnp.float32)       # Conv2d(1,NV,(L,1)) weight
    bv = scale * jax.random.normal(ks[1], (NV,), jnp.float32)
    # wh_full[i-1, c, k, h] = i-th horizontal Conv2d(1,NH,(i,H)) weight (only k < i is used)
    wh_full = scale * jax.random.normal(ks[2], (L, NH, L, H), jnp.float32)
    bh = scale * jax.random.normal(ks[3], (L, NH), jnp.float32)
    wf = scale * jax.random.normal(ks[4], (H, F_IN), jnp.float32)     # Linear(F_IN, H) weight
    bf = scale * jax.random.normal(ks[5], (H,), jnp.float32)
    return (wv, bv, wh_full, bh, wf, bf)


def pack_params(canon):
    """One-time repacking into lane-dense, matmul-friendly layouts (3 arrays)."""
    wv, bv, wh_full, bh, wf, bf = canon

    # Vertical conv block: wvk[l*H+h', c*H+h] = wv[c,l]*delta(h,h')  -> (L*H, NV*H)
    wvk = jnp.kron(wv.T, jnp.eye(H, dtype=jnp.float32))

    # Horizontal convs as one block-Toeplitz block (no unfold needed anywhere):
    #   W_toe[l*H+h, t*(L*NH)+(i-1)*NH+c] = wh_full[i-1, c, l-t, h] if 0 <= l-t < i else 0
    l = jnp.arange(L)
    t = jnp.arange(L)
    i = jnp.arange(1, L + 1)
    k = l[:, None] - t[None, :]                                            # (L_l, L_t)
    valid = (k[:, :, None] >= 0) & (k[:, :, None] < i[None, None, :])      # (L_l, L_t, L_i)
    gath = wh_full[:, :, jnp.clip(k, 0, L - 1), :]                         # (L_i, NH, L_l, L_t, H)
    toe = jnp.where(valid.transpose(2, 0, 1)[:, None, :, :, None], gath, 0.0)
    w_toe = toe.transpose(2, 4, 3, 0, 1).reshape(L * H, L * L * NH)        # (256, 256)

    w_conv = jnp.concatenate([wvk, w_toe], axis=1)                         # (256, 384)

    # Packed bias row: [bv repeated over H | bh per (t,i,c) column with NEG on invalid
    # sliding positions (t + i > L), so ReLU zeroes them | fc bias padded to 128 lanes].
    t_col = jnp.arange(L)[:, None]                                         # sliding position t
    i_col = jnp.repeat(jnp.arange(1, L + 1), NH)[None, :]                  # window size i per col
    bh_tile = jnp.tile(bh.reshape(-1)[None, :], (L, 1))                    # (L_t, L*NH)
    bh_cols = jnp.where(t_col + i_col <= L, bh_tile, NEG).reshape(-1)      # (L*L*NH,)
    b_conv = jnp.concatenate([jnp.repeat(bv, H), bh_cols])                 # (384,)
    b_fc = jnp.pad(bf, (0, OUT_PAD - H))                                   # (128,)
    b_pack = jnp.concatenate([b_conv, b_fc])[None, :]                      # (1, 512)

    # fc weight: transpose and pad the output dim to 128 lanes.
    w_fc = jnp.pad(wf.T, ((0, 0), (0, OUT_PAD - H)))                       # (160, 128)

    return (w_conv, w_fc, b_pack)


def ref_forward(x, canon):
    """Pure-JAX reference mirroring the PyTorch forward semantics."""
    wv, bv, wh_full, bh, wf, bf = canon
    # vertical conv -> (B, NV, H); adaptive_max_pool2d((1, H)) is identity (height already 1)
    v = jnp.einsum('cl,blh->bch', wv, x) + bv[None, :, None]
    vfeat = v.reshape(B, NV * H)
    hfeats = []
    for i in range(1, L + 1):
        w_i = wh_full[i - 1, :, :i, :]                                   # (NH, i, H)
        npos = L - i + 1
        conv = jnp.stack(
            [jnp.einsum('bkh,ckh->bc', x[:, t:t + i, :], w_i) for t in range(npos)],
            axis=2) + bh[i - 1][None, :, None]                           # (B, NH, npos)
        conv = jax.nn.relu(conv)
        hfeats.append(jnp.max(conv, axis=2))                             # (B, NH)
    hfeat = jnp.concatenate(hfeats, axis=1)                              # (B, NH*L)
    feat = jnp.concatenate([vfeat, hfeat], axis=1)                       # (B, F_IN)
    return jax.nn.relu(feat @ wf.T + bf[None, :])                        # (B, H)


if __name__ == "__main__":
    key = jax.random.PRNGKey(0)
    kx, kp = jax.random.split(key)
    x = jax.random.normal(kx, (B, L, H), jnp.float32)    # inputs_embeds
    canon = make_params(kp)
    packed = pack_params(canon)

    fwd = jax.jit(caser_forward)
    out = jax.block_until_ready(fwd(x, packed))

    ref = ref_forward(x, canon)
    assert out.shape == (B, H)
    np.testing.assert_allclose(np.asarray(out), np.asarray(ref), rtol=2e-3, atol=2e-3)
    print("KERNEL_OK")
</pallas_src>

<mosaic_0001>
module attributes {stable_mosaic.version = 11 : i64} {
  func.func @caser_kernel(%arg0: memref<2x256xf32, #tpu.memory_space<vmem>>, %arg1: memref<256x384xf32, #tpu.memory_space<vmem>>, %arg2: memref<160x128xf32, #tpu.memory_space<vmem>>, %arg3: memref<1x512xf32, #tpu.memory_space<vmem>>, %arg4: memref<2x128xf32, #tpu.memory_space<vmem>>) attributes {dimension_semantics = [], scalar_prefetch = 0 : i64, scratch_operands = 0 : i64, tpu.core_type = #tpu.core_type<tc>} {
    %c0 = arith.constant 0 : index
    %c0_0 = arith.constant 0 : index
    %0 = vector.load %arg0[%c0, %c0_0] : memref<2x256xf32, #tpu.memory_space<vmem>>, vector<2x256xf32>
    %c0_1 = arith.constant 0 : index
    %c0_2 = arith.constant 0 : index
    %1 = vector.load %arg1[%c0_1, %c0_2] : memref<256x384xf32, #tpu.memory_space<vmem>>, vector<256x384xf32>
    %cst = arith.constant dense<0.000000e+00> : vector<2x384xf32>
    %2 = tpu.matmul %0, %1, %cst {dimension_numbers = #tpu.dot_dimension_numbers<[1], [0], [0], [1], [0, 0, 1, 1], [], []>} : vector<2x256xf32>, vector<256x384xf32>, vector<2x384xf32> -> vector<2x384xf32>
    %c0_3 = arith.constant 0 : index
    %c0_4 = arith.constant 0 : index
    %3 = vector.load %arg3[%c0_3, %c0_4] : memref<1x512xf32, #tpu.memory_space<vmem>>, vector<1x384xf32>
    %4 = vector.broadcast %3 : vector<1x384xf32> to vector<2x384xf32>
    %5 = arith.addf %2, %4 : vector<2x384xf32>
    %6 = vector.extract_strided_slice %5 {offsets = [0, 0], sizes = [2, 128], strides = [1, 1]} : vector<2x384xf32> to vector<2x128xf32>
    %7 = vector.extract_strided_slice %5 {offsets = [0, 128], sizes = [2, 256], strides = [1, 1]} : vector<2x384xf32> to vector<2x256xf32>
    %cst_5 = arith.constant 0.000000e+00 : f32
    %8 = vector.broadcast %cst_5 : f32 to vector<2x256xf32>
    %9 = arith.maximumf %7, %8 : vector<2x256xf32>
    %10 = vector.extract_strided_slice %9 {offsets = [0, 0], sizes = [2, 32], strides = [1, 1]} : vector<2x256xf32> to vector<2x32xf32>
    %11 = vector.extract_strided_slice %9 {offsets = [0, 32], sizes = [2, 32], strides = [1, 1]} : vector<2x256xf32> to vector<2x32xf32>
    %12 = arith.maximumf %10, %11 : vector<2x32xf32>
    %13 = vector.extract_strided_slice %9 {offsets = [0, 64], sizes = [2, 32], strides = [1, 1]} : vector<2x256xf32> to vector<2x32xf32>
    %14 = arith.maximumf %12, %13 : vector<2x32xf32>
    %15 = vector.extract_strided_slice %9 {offsets = [0, 96], sizes = [2, 32], strides = [1, 1]} : vector<2x256xf32> to vector<2x32xf32>
    %16 = arith.maximumf %14, %15 : vector<2x32xf32>
    %17 = vector.extract_strided_slice %9 {offsets = [0, 128], sizes = [2, 32], strides = [1, 1]} : vector<2x256xf32> to vector<2x32xf32>
    %18 = arith.maximumf %16, %17 : vector<2x32xf32>
    %19 = vector.extract_strided_slice %9 {offsets = [0, 160], sizes = [2, 32], strides = [1, 1]} : vector<2x256xf32> to vector<2x32xf32>
    %20 = arith.maximumf %18, %19 : vector<2x32xf32>
    %21 = vector.extract_strided_slice %9 {offsets = [0, 192], sizes = [2, 32], strides = [1, 1]} : vector<2x256xf32> to vector<2x32xf32>
    %22 = arith.maximumf %20, %21 : vector<2x32xf32>
    %23 = vector.extract_strided_slice %9 {offsets = [0, 224], sizes = [2, 32], strides = [1, 1]} : vector<2x256xf32> to vector<2x32xf32>
    %24 = arith.maximumf %22, %23 : vector<2x32xf32>
    %25 = tpu.concatenate %6, %24 in 1 : vector<2x128xf32>, vector<2x32xf32> -> vector<2x160xf32>
    %c0_6 = arith.constant 0 : index
    %c0_7 = arith.constant 0 : index
    %26 = vector.load %arg2[%c0_6, %c0_7] : memref<160x128xf32, #tpu.memory_space<vmem>>, vector<160x128xf32>
    %cst_8 = arith.constant dense<0.000000e+00> : vector<2x128xf32>
    %27 = tpu.matmul %25, %26, %cst_8 {dimension_numbers = #tpu.dot_dimension_numbers<[1], [0], [0], [1], [0, 0, 1, 1], [], []>} : vector<2x160xf32>, vector<160x128xf32>, vector<2x128xf32> -> vector<2x128xf32>
    %c0_9 = arith.constant 0 : index
    %c384 = arith.constant 384 : index
    %28 = vector.load %arg3[%c0_9, %c384] : memref<1x512xf32, #tpu.memory_space<vmem>>, vector<1x128xf32>
    %29 = vector.broadcast %28 : vector<1x128xf32> to vector<2x128xf32>
    %30 = arith.addf %27, %29 : vector<2x128xf32>
    %cst_10 = arith.constant 0.000000e+00 : f32
    %31 = vector.broadcast %cst_10 : f32 to vector<2x128xf32>
    %32 = arith.maximumf %30, %31 : vector<2x128xf32>
    %c0_11 = arith.constant 0 : index
    %c0_12 = arith.constant 0 : index
    %33 = vector.load %arg4[%c0_11, %c0_12] : memref<2x128xf32, #tpu.memory_space<vmem>>, vector<2x128xf32>
    tpu.vector_store %arg4[%c0_11, %c0_12], %32 {strides = array<i32>} : memref<2x128xf32, #tpu.memory_space<vmem>>, vector<2x128xf32>,
    return
  }
}

</mosaic_0001>

<bundles_post_ra>
// kernel: caser_forward.1
= control target key start
LH: loop header
LB: loop body
LE: loop exit
PB: predicated region body
PF: predicated region fallthrough
CT: control target
= control target key end

     0   :  { %9 = vsyncpa [#allocation3], 0  ;;  %s551_s0 = inlined_call_operand.vmem [shape: f32[2,256], index: 0, kind: input, shape index: {}]   ;;  %s552_s1 = inlined_call_operand.hbm [shape: f32[256,384], index: 1, kind: input, shape index: {}]   ;;  %s553_s2 = inlined_call_operand.hbm [shape: f32[160,128], index: 2, kind: input, shape index: {}]   ;;  %s554_s3 = inlined_call_operand.vmem [shape: f32[1,512], index: 3, kind: input, shape index: {}]   ;;  %s555_s4 = inlined_call_operand.hbm [shape: f32[2,128], index: 4, kind: output, shape index: {}]  }
   0x1   :  { %10 = vsyncpa [#allocation6], 0 }
   0x2   :  { %11 = vsyncpa [#allocation4], 0  ;;  %s18_s17 = sshll.u32 %s552_s1, 4  ;;  %s488_s18 = smov [#allocation2]   ;;  %s19_s17 = int_to_ptr.hbm [resolvable:$true] %s18_s17 }
   0x3   :  { %s20_s19 = sshll.u32 %s488_s18, 4  ;;  %s31_s22 = sshll.u32 %s553_s2, 4  ;;  %s21_s19 = int_to_ptr.vmem [resolvable:$true] %s20_s19  ;;  %s32_s22 = int_to_ptr.hbm [resolvable:$true] %s31_s22 }
   0x4   :  { %s489_s23 = smov 384   ;;  %s490_s24 = smov 24  }
   0x5   :  { %26 = dma.hbm_to_vmem [thread:$0]  %s19_s17, 12288, %s21_s19, [#allocation3], %s489_s23, %s489_s23, %s490_s24  }
   0x6   :  { %s491_s25 = smov [#allocation5]   ;;  %s492_s27 = smov 128  }
   0x7   :  { %s33_s26 = sshll.u32 %s491_s25, 4  ;;  %s493_s28 = smov 8   ;;  %s34_s26 = int_to_ptr.vmem [resolvable:$true] %s33_s26 }
   0x8   :  { %39 = dma.hbm_to_vmem [thread:$0]  %s32_s22, 2560, %s34_s26, [#allocation6], %s492_s27, %s492_s27, %s493_s28  }
   0x9   :  { %482 = dma.done.wait [#allocation3], 12288  }
   0xa   :  { %483 = vsyncadd [#allocation3], 4294955008 }
   0xb   :  { %484 = dma.done.wait [#allocation6], 2560  }
   0xc   :  { %485 = vsyncadd [#allocation6], 4294964736  ;;  %v96_v0 = vld [vmem:[#allocation2 + $0x168] sm:$0xff]  ;;  %v97_v1 = vld [vmem:[#allocation2 + $0x170] sm:$0xff]  ;;  %s494_s30 = smov 96   ;;  %s495_s5 = smov 32  }
   0xd   :  { %v93_v2 = vld [vmem:[#allocation2 + $0x150] sm:$0xff]  ;;  %161 = vmatpush.msra.mxu0 %v96_v0  ;;  %201 = vmatpush.msra.mxu2 %v97_v1  ;;  %v144_v3 = vld [vmem:[#allocation2 + $0x2e8] sm:$0xff]  ;;  %v94_v4 = vld [vmem:[#allocation2 + $0x158] sm:$0xff]  ;;  %s496_s6 = smov 64   ;;  %vm334_vm0 = vcmask 261120   ;;  %s497_s9 = smov [#allocation7]  }
   0xe   :  { %v145_v5 = vld [vmem:[#allocation2 + $0x2f0] sm:$0xff]  ;;  %181 = vmatpush.msra.mxu1 %v144_v3  ;;  %v90_v6 = vld [vmem:[#allocation2 + $0x138] sm:$0xff]  ;;  %v91_v8 = vld [vmem:[#allocation2 + $0x140] sm:$0xff]  ;;  %s385_s10 = sshll.u32 %s497_s9, 4  ;;  %s387_s13 = sshll.u32 %s555_s4, 4  ;;  %s386_s10 = int_to_ptr.vmem [resolvable:$true] %s385_s10  ;;  %s388_s13 = int_to_ptr.hbm [resolvable:$true] %s387_s13 }
   0xf   :  { %221 = vmatpush.msra.mxu3 %v145_v5  ;;  %v141_v7 = vld [vmem:[#allocation2 + $0x2d0] sm:$0xff]  ;;  %162 = vmatpush.msra.mxu0 %v93_v2  ;;  %v142_v9 = vld [vmem:[#allocation2 + $0x2d8] sm:$0xff]  ;;  %v87_v11 = vld [vmem:[#allocation2 + $0x120] sm:$0xff] }
  0x10   :  { %202 = vmatpush.msra.mxu2 %v94_v4  ;;  %v138_v10 = vld [vmem:[#allocation2 + $0x2b8] sm:$0xff]  ;;  %182 = vmatpush.msra.mxu1 %v141_v7  ;;  %v88_v12 = vld [vmem:[#allocation2 + $0x128] sm:$0xff]  ;;  %v139_v13 = vld [vmem:[#allocation2 + $0x2c0] sm:$0xff] }
  0x11   :  { %222 = vmatpush.msra.mxu3 %v142_v9  ;;  %163 = vmatpush.msra.mxu0 %v90_v6  ;;  %v135_v14 = vld [vmem:[#allocation2 + $0x2a0] sm:$0xff]  ;;  %v136_v15 = vld [vmem:[#allocation2 + $0x2a8] sm:$0xff]  ;;  %v85_v17 = vld [vmem:[#allocation2 + $0x110] sm:$0xff] }
  0x12   :  { %203 = vmatpush.msra.mxu2 %v91_v8  ;;  %183 = vmatpush.msra.mxu1 %v138_v10  ;;  %v84_v16 = vld [vmem:[#allocation2 + $0x108] sm:$0xff]  ;;  %v133_v19 = vld [vmem:[#allocation2 + $0x290] sm:$0xff]  ;;  %v82_v21 = vld [vmem:[#allocation2 + $0xf8] sm:$0xff] }
  0x13   :  { %223 = vmatpush.msra.mxu3 %v139_v13  ;;  %164 = vmatpush.msra.mxu0 %v87_v11  ;;  %v132_v18 = vld [vmem:[#allocation2 + $0x288] sm:$0xff]  ;;  %v81_v20 = vld [vmem:[#allocation2 + $0xf0] sm:$0xff]  ;;  %v130_v23 = vld [vmem:[#allocation2 + $0x278] sm:$0xff] }
  0x14   :  { %204 = vmatpush.msra.mxu2 %v88_v12  ;;  %184 = vmatpush.msra.mxu1 %v135_v14  ;;  %v129_v22 = vld [vmem:[#allocation2 + $0x270] sm:$0xff]  ;;  %v78_v24 = vld [vmem:[#allocation2 + $0xd8] sm:$0xff]  ;;  %v79_v25 = vld [vmem:[#allocation2 + $0xe0] sm:$0xff] }
  0x15   :  { %224 = vmatpush.msra.mxu3 %v136_v15  ;;  %165 = vmatpush.msra.mxu0 %v84_v16  ;;  %v126_v26 = vld [vmem:[#allocation2 + $0x258] sm:$0xff]  ;;  %v127_v27 = vld [vmem:[#allocation2 + $0x260] sm:$0xff]  ;;  %v76_v29 = vld [vmem:[#allocation2 + $0xc8] sm:$0xff] }
  0x16   :  { %205 = vmatpush.msra.mxu2 %v85_v17  ;;  %185 = vmatpush.msra.mxu1 %v132_v18  ;;  %v75_v28 = vld [vmem:[#allocation2 + $0xc0] sm:$0xff]  ;;  %v124_v31 = vld [vmem:[#allocation2 + $0x248] sm:$0xff]  ;;  %v73_v33 = vld [vmem:[#allocation2 + $0xb0] sm:$0xff] }
  0x17   :  { %225 = vmatpush.msra.mxu3 %v133_v19  ;;  %166 = vmatpush.msra.mxu0 %v81_v20  ;;  %v123_v30 = vld [vmem:[#allocation2 + $0x240] sm:$0xff]  ;;  %v72_v32 = vld [vmem:[#allocation2 + $0xa8] sm:$0xff]  ;;  %v121_v35 = vld [vmem:[#allocation2 + $0x230] sm:$0xff] }
  0x18   :  { %206 = vmatpush.msra.mxu2 %v82_v21  ;;  %186 = vmatpush.msra.mxu1 %v129_v22  ;;  %v120_v34 = vld [vmem:[#allocation2 + $0x228] sm:$0xff]  ;;  %v69_v36 = vld [vmem:[#allocation2 + $0x90] sm:$0xff]  ;;  %v70_v37 = vld [vmem:[#allocation2 + $0x98] sm:$0xff] }
  0x19   :  { %226 = vmatpush.msra.mxu3 %v130_v23  ;;  %167 = vmatpush.msra.mxu0 %v78_v24  ;;  %v117_v38 = vld [vmem:[#allocation2 + $0x210] sm:$0xff]  ;;  %v118_v39 = vld [vmem:[#allocation2 + $0x218] sm:$0xff]  ;;  %v67_v41 = vld [vmem:[#allocation2 + $0x80] sm:$0xff] }
  0x1a   :  { %207 = vmatpush.msra.mxu2 %v79_v25  ;;  %187 = vmatpush.msra.mxu1 %v126_v26  ;;  %v66_v40 = vld [vmem:[#allocation2 + $0x78] sm:$0xff]  ;;  %v115_v43 = vld [vmem:[#allocation2 + $0x200] sm:$0xff]  ;;  %v64_v45 = vld [vmem:[#allocation2 + $0x68] sm:$0xff] }
  0x1b   :  { %227 = vmatpush.msra.mxu3 %v127_v27  ;;  %168 = vmatpush.msra.mxu0 %v75_v28  ;;  %v114_v42 = vld [vmem:[#allocation2 + $0x1f8] sm:$0xff]  ;;  %v63_v44 = vld [vmem:[#allocation2 + $0x60] sm:$0xff]  ;;  %v112_v48 = vld [vmem:[#allocation2 + $0x1e8] sm:$0xff] }
  0x1c   :  { %208 = vmatpush.msra.mxu2 %v76_v29  ;;  %188 = vmatpush.msra.mxu1 %v123_v30  ;;  %v50_v46 = vld [vmem:[%s551_s0] sm:$0xf]  ;;  %v111_v47 = vld [vmem:[#allocation2 + $0x1e0] sm:$0xff]  ;;  %v60_v49 = vld [vmem:[#allocation2 + $0x48] sm:$0xff] }
  0x1d   :  { %228 = vmatpush.msra.mxu3 %v124_v31  ;;  %169 = vmatpush.msra.mxu0 %v72_v32  ;;  %156 = vst [vmem:[#allocation1] ss:$4 sm:$0xff] %v50_v46  ;;  %v61_v50 = vld [vmem:[#allocation2 + $0x50] sm:$0xff]  ;;  %v108_v51 = vld [vmem:[#allocation2 + $0x1c8] sm:$0xff]  ;;  %v58_v54 = vld [vmem:[#allocation2 + $0x38] sm:$0xff] }
  0x1e   :  { %209 = vmatpush.msra.mxu2 %v73_v33  ;;  %189 = vmatpush.msra.mxu1 %v120_v34  ;;  %v109_v52 = vld [vmem:[#allocation2 + $0x1d0] sm:$0xff]  ;;  %v106_v56 = vld [vmem:[#allocation2 + $0x1b8] sm:$0xff]  ;;  %v55_v58 = vld [vmem:[#allocation2 + $0x20] sm:$0xff] }
  0x1f   :  { %229 = vmatpush.msra.mxu3 %v121_v35  ;;  %170 = vmatpush.msra.mxu0 %v69_v36  ;;  %v57_v53 = vld [vmem:[#allocation2 + $0x30] sm:$0xff]  ;;  %v54_v57 = vld [vmem:[#allocation2 + $0x18] sm:$0xff]  ;;  %v103_v60 = vld [vmem:[#allocation2 + $0x1a0] sm:$0xff] }
  0x20   :  { %210 = vmatpush.msra.mxu2 %v70_v37  ;;  %190 = vmatpush.msra.mxu1 %v117_v38  ;;  %v105_v55 = vld [vmem:[#allocation2 + $0x1b0] sm:$0xff]  ;;  %v102_v59 = vld [vmem:[#allocation2 + $0x198] sm:$0xff]  ;;  %v51_v61 = vld [vmem:[#allocation2] sm:$0xff] }
  0x21   :  { %230 = vmatpush.msra.mxu3 %v118_v39  ;;  %171 = vmatpush.msra.mxu0 %v66_v40  ;;  %v52_v62 = vld [vmem:[#allocation2 + $0x8] sm:$0xff]  ;;  %v98_v0 = vld [vmem:[#allocation2 + $0x178] sm:$0xff]  ;;  %v99_v1 = vld [vmem:[#allocation2 + $0x180] sm:$0xff] }
  0x22   :  { %211 = vmatpush.msra.mxu2 %v67_v41  ;;  %191 = vmatpush.msra.mxu1 %v114_v42  ;;  %v100_v2 = vld [vmem:[#allocation2 + $0x188] sm:$0xff]  ;;  %v95_v4 = vld [vmem:[#allocation2 + $0x160] sm:$0xff]  ;;  %v146_v5 = vld [vmem:[#allocation2 + $0x2f8] sm:$0xff] }
  0x23   :  { %231 = vmatpush.msra.mxu3 %v115_v43  ;;  %172 = vmatpush.msra.mxu0 %v63_v44  ;;  %v92_v6 = vld [vmem:[#allocation2 + $0x148] sm:$0xff]  ;;  %v143_v7 = vld [vmem:[#allocation2 + $0x2e0] sm:$0xff]  ;;  %v325_v8 = vld [vmem:[#allocation5 + $0x78] sm:$0xff] }
  0x24   :  { %212 = vmatpush.msra.mxu2 %v64_v45  ;;  %192 = vmatpush.msra.mxu1 %v111_v47  ;;  %v532_v63 = vld.sshfl [vmem:[#allocation1] sm:$0xff pattern:$0x73625140]  ;;  %v534_v3 = vld.sshfl [vmem:[#allocation1 + $0x8] sm:$0xff pattern:$0x73625140] }
  0x25   :  { %232 = vmatpush.msra.mxu3 %v112_v48  ;;  %173 = vmatpush.msra.mxu0 %v60_v49  ;;  %v89_v9 = vld [vmem:[#allocation2 + $0x130] sm:$0xff]  ;;  %v140_v10 = vld [vmem:[#allocation2 + $0x2c8] sm:$0xff]  ;;  %v86_v12 = vld [vmem:[#allocation2 + $0x118] sm:$0xff] }
  0x26   :  { %213 = vmatpush.msra.mxu2 %v61_v50  ;;  %193 = vmatpush.msra.mxu1 %v108_v51  ;;  %v324_v11 = vld [vmem:[#allocation5 + $0x70] sm:$0xff]  ;;  %v323_v14 = vld [vmem:[#allocation5 + $0x68] sm:$0xff]  ;;  %v83_v15 = vld [vmem:[#allocation2 + $0x100] sm:$0xff] }
  0x27   :  { %233 = vmatpush.msra.mxu3 %v109_v52  ;;  %174 = vmatpush.msra.mxu0 %v57_v53  ;;  %v137_v13 = vld [vmem:[#allocation2 + $0x2b0] sm:$0xff]  ;;  %v134_v16 = vld [vmem:[#allocation2 + $0x298] sm:$0xff]  ;;  %v322_v17 = vld [vmem:[#allocation5 + $0x60] sm:$0xff] }
  0x28   :  { %214 = vmatpush.msra.mxu2 %v58_v54  ;;  %194 = vmatpush.msra.mxu1 %v105_v55  ;;  %v80_v18 = vld [vmem:[#allocation2 + $0xe8] sm:$0xff]  ;;  %v131_v19 = vld [vmem:[#allocation2 + $0x280] sm:$0xff]  ;;  %v321_v20 = vld [vmem:[#allocation5 + $0x58] sm:$0xff] }
  0x29   :  { %234 = vmatpush.msra.mxu3 %v106_v56  ;;  %175 = vmatpush.msra.mxu0 %v54_v57  ;;  %v77_v21 = vld [vmem:[#allocation2 + $0xd0] sm:$0xff]  ;;  %v128_v22 = vld [vmem:[#allocation2 + $0x268] sm:$0xff]  ;;  %v74_v23 = vld [vmem:[#allocation2 + $0xb8] sm:$0xff] }
  0x2a   :  { %215 = vmatpush.msra.mxu2 %v55_v58  ;;  %195 = vmatpush.msra.mxu1 %v102_v59  ;;  %v125_v24 = vld [vmem:[#allocation2 + $0x250] sm:$0xff]  ;;  %v71_v25 = vld [vmem:[#allocation2 + $0xa0] sm:$0xff]  ;;  %v122_v26 = vld [vmem:[#allocation2 + $0x238] sm:$0xff] }
  0x2b   :  { %235 = vmatpush.msra.mxu3 %v103_v60  ;;  %176 = vmatpush.msra.mxu0 %v51_v61  ;;  %v68_v27 = vld [vmem:[#allocation2 + $0x88] sm:$0xff]  ;;  %v119_v28 = vld [vmem:[#allocation2 + $0x220] sm:$0xff]  ;;  %v65_v29 = vld [vmem:[#allocation2 + $0x70] sm:$0xff] }
  0x2c   :  { %216 = vmatpush.msra.mxu2 %v52_v62  ;;  %196 = vmatpush.msra.mxu1 %v99_v1  ;;  %v116_v30 = vld [vmem:[#allocation2 + $0x208] sm:$0xff]  ;;  %v62_v31 = vld [vmem:[#allocation2 + $0x58] sm:$0xff]  ;;  %v113_v32 = vld [vmem:[#allocation2 + $0x1f0] sm:$0xff] }
  0x2d   :  { %217 = vmatmul.f32.vlgmr.msra.gmra.mxu2 %v532_v63  ;;  %241 = vmatpush.msrb.mxu0 %v98_v0  ;;  %v59_v33 = vld [vmem:[#allocation2 + $0x40] sm:$0xff]  ;;  %v110_v34 = vld [vmem:[#allocation2 + $0x1d8] sm:$0xff]  ;;  %v56_v35 = vld [vmem:[#allocation2 + $0x28] sm:$0xff] }
  0x2e   :  { %236 = vmatpush.msra.mxu3 %v100_v2  ;;  %261 = vmatpush.msrb.mxu1 %v146_v5  ;;  %v107_v36 = vld [vmem:[#allocation2 + $0x1c0] sm:$0xff]  ;;  %v53_v37 = vld [vmem:[#allocation2 + $0x10] sm:$0xff]  ;;  %v104_v38 = vld [vmem:[#allocation2 + $0x1a8] sm:$0xff] }
  0x2f   :  { %237 = vmatmul.f32.vlgmr.msra.gmra.mxu3 %v534_v3  ;;  %242 = vmatpush.msrb.mxu0 %v95_v4  ;;  %v101_v39 = vld [vmem:[#allocation2 + $0x190] sm:$0xff]  ;;  %v319_v41 = vld [vmem:[#allocation5 + $0x48] sm:$0xff]  ;;  %v318_v42 = vld [vmem:[#allocation5 + $0x40] sm:$0xff] }
  0x30   :  { %177 = vmatmul.f32.vlgmr.msra.gmra.mxu0 %v532_v63  ;;  %197 = vmatmul.f32.vlgmr.msra.gmra.mxu1 %v534_v3  ;;  %v320_v40 = vld [vmem:[#allocation5 + $0x50] sm:$0xff]  ;;  %v317_v43 = vld [vmem:[#allocation5 + $0x38] sm:$0xff]  ;;  %v315_v45 = vld [vmem:[#allocation5 + $0x28] sm:$0xff] }
  0x31   :  { %243 = vmatpush.msrb.mxu0 %v92_v6  ;;  %262 = vmatpush.msrb.mxu1 %v143_v7  ;;  %v316_v44 = vld [vmem:[#allocation5 + $0x30] sm:$0xff]  ;;  %v314_v46 = vld [vmem:[#allocation5 + $0x20] sm:$0xff]  ;;  %v313_v47 = vld [vmem:[#allocation5 + $0x18] sm:$0xff] }
  0x32   :  { %338 = vmatpush.msrb.mxu2 %v325_v8  ;;  %v312_v48 = vld [vmem:[#allocation5 + $0x10] sm:$0xff]  ;;  %v311_v49 = vld [vmem:[#allocation5 + $0x8] sm:$0xff]  ;;  %v310_v50 = vld [vmem:[#allocation5] sm:$0xff] }
  0x33   :  { %244 = vmatpush.msrb.mxu0 %v89_v9  ;;  %263 = vmatpush.msrb.mxu1 %v140_v10  ;;  %v147_v51 = vld [vmem:[%s554_s3] sm:$0x7]  ;;  %v328_v6 = vld [vmem:[#allocation5 + $0x90] sm:$0xff]  ;;  %v327_v7 = vld [vmem:[#allocation5 + $0x88] sm:$0xff] }
  0x34   :  { %339 = vmatpush.msrb.mxu2 %v324_v11  ;;  %v149_v52 = vperm.slane %v147_v51, 0  ;;  %v150_v53 = vperm.slane %v147_v51, 1  ;;  %v329_v5 = vld [vmem:[#allocation5 + $0x98] sm:$0xff]  ;;  %v326_v8 = vld [vmem:[#allocation5 + $0x80] sm:$0xff] }
  0x35   :  { %245 = vmatpush.msrb.mxu0 %v86_v12  ;;  %264 = vmatpush.msrb.mxu1 %v137_v13 }
  0x36   :  { %340 = vmatpush.msrb.mxu2 %v323_v14  ;;  %370 = vmatpush.msrb.mxu3 %v329_v5 }
  0x37   :  { %246 = vmatpush.msrb.mxu0 %v83_v15  ;;  %265 = vmatpush.msrb.mxu1 %v134_v16 }
  0x38   :  { %341 = vmatpush.msrb.mxu2 %v322_v17  ;;  %371 = vmatpush.msrb.mxu3 %v328_v6 }
  0x39   :  { %247 = vmatpush.msrb.mxu0 %v80_v18  ;;  %266 = vmatpush.msrb.mxu1 %v131_v19 }
  0x3a   :  { %342 = vmatpush.msrb.mxu2 %v321_v20  ;;  %372 = vmatpush.msrb.mxu3 %v327_v7 }
  0x3b   :  { %248 = vmatpush.msrb.mxu0 %v77_v21  ;;  %267 = vmatpush.msrb.mxu1 %v128_v22  ;;  %v409_v22 = vld [vmem:[%s554_s3 + $0x3] ss:$0 sm:$0xff] }
  0x3c   :  { %343 = vmatpush.msrb.mxu2 %v320_v40  ;;  %373 = vmatpush.msrb.mxu3 %v326_v8 }
  0x3d   :  { %249 = vmatpush.msrb.mxu0 %v74_v23  ;;  %268 = vmatpush.msrb.mxu1 %v125_v24 }
  0x3e   :  { %344 = vmatpush.msrb.mxu2 %v319_v41 }
  0x3f   :  { %250 = vmatpush.msrb.mxu0 %v71_v25  ;;  %269 = vmatpush.msrb.mxu1 %v122_v26 }
  0x40   :  { %345 = vmatpush.msrb.mxu2 %v318_v42 }
  0x41   :  { %251 = vmatpush.msrb.mxu0 %v68_v27  ;;  %270 = vmatpush.msrb.mxu1 %v119_v28 }
  0x42   :  { %346 = vmatpush.msrb.mxu2 %v317_v43 }
  0x43   :  { %252 = vmatpush.msrb.mxu0 %v65_v29  ;;  %271 = vmatpush.msrb.mxu1 %v116_v30 }
  0x44   :  { %347 = vmatpush.msrb.mxu2 %v316_v44 }
  0x45   :  { %253 = vmatpush.msrb.mxu0 %v62_v31  ;;  %272 = vmatpush.msrb.mxu1 %v113_v32 }
  0x46   :  { %348 = vmatpush.msrb.mxu2 %v315_v45 }
  0x47   :  { %254 = vmatpush.msrb.mxu0 %v59_v33  ;;  %273 = vmatpush.msrb.mxu1 %v110_v34 }
  0x48   :  { %349 = vmatpush.msrb.mxu2 %v314_v46 }
  0x49   :  { %255 = vmatpush.msrb.mxu0 %v56_v35  ;;  %274 = vmatpush.msrb.mxu1 %v107_v36 }
  0x4a   :  { %350 = vmatpush.msrb.mxu2 %v313_v47 }
  0x4b   :  { %256 = vmatpush.msrb.mxu0 %v53_v37  ;;  %275 = vmatpush.msrb.mxu1 %v104_v38 }
  0x4c   :  { %257 = vmatmul.f32.vlgmr.msrb.gmra.mxu0 %v532_v63  ;;  %351 = vmatpush.msrb.mxu2 %v312_v48  ;;  %v151_v63 = vperm.slane %v147_v51, 2 }
  0x4d   :  { %276 = vmatpush.msrb.mxu1 %v101_v39 }
  0x4e   :  { %277 = vmatmul.f32.vlgmr.msrb.gmra.mxu1 %v534_v3  ;;  %352 = vmatpush.msrb.mxu2 %v311_v49 }
  0x50   :  { %353 = vmatpush.msrb.mxu2 %v310_v50 }
  0xad   :  { %v178_v54 = vpop.f32.mrf.mxu0  ;;  %v198_v56 = vpop.f32.mrf.mxu1 }
  0xae   :  { %v179_v55 = vadd.f32 %v178_v54, %v149_v52 }
  0xb0   :  { %v218_v57 = vpop.f32.mrf.mxu2  ;;  %v199_v58 = vadd.f32 %v198_v56, %v179_v55 }
  0xb1   :  { %v219_v59 = vadd.f32 %v218_v57, %v150_v53 }
  0xb2   :  { %v238_v60 = vpop.f32.mrf.mxu3  ;;  %354 = vmatmul.f32.vlgmr.msrb.gmra.mxu2 %v199_v58 }
  0xb3   :  { %v239_v61 = vadd.f32 %v238_v60, %v219_v59 }
  0xb5   :  { %v281_v62 = vmax.f32 %v239_v61, 0.0 }
  0xb7   :  { %284 = vrot.lane.b32.xlu0 %v281_v62, %s494_s30  ;;  %292 = vrot.lane.b32.xlu1 %v281_v62, %s495_s5 }
  0xbf   :  { %288 = vrot.lane.b32.xlu0 %v281_v62, %s496_s6 }
  0xc9   :  { %v258_v0 = vpop.f32.mrf.mxu0 }
  0xca   :  { %v259_v1 = vadd.f32 %v258_v0, %v151_v63 }
  0xcb   :  { %v278_v2 = vpop.f32.mrf.mxu1 }
  0xcc   :  { %v279_v3 = vadd.f32 %v278_v2, %v259_v1 }
  0xce   :  { %v282_v4 = vmax.f32 %v279_v3, 0.0 }
  0xd0   :  { %302 = vrot.lane.b32.xlu2 %v282_v4, %s496_s6  ;;  %298 = vrot.lane.b32.xlu1 %v282_v4, %s494_s30 }
  0xd8   :  { %306 = vrot.lane.b32.xlu2 %v282_v4, %s495_s5 }
 0x129   :  { %v285_v9 = vpop.permute.xlu0 %284  ;;  %v293_v13 = vpop.permute.xlu1 %292 }
 0x12a   :  { %v287_v11 = vmax.f32 %v281_v62, %v285_v9  ;;  %v303_v14 = vpop.permute.xlu2 %302 }
 0x131   :  { %v289_v10 = vpop.permute.xlu0 %288 }
 0x132   :  { %v291_v12 = vmax.f32 %v287_v11, %v289_v10  ;;  %v307_v20 = vpop.permute.xlu2 %306 }
 0x134   :  { %v295_v15 = vmax.f32 %v291_v12, %v293_v13 }
 0x135   :  { %v355_v23 = vpop.f32.mrf.mxu2 }
 0x136   :  { %v296_v16 = vmax.f32 %v295_v15, %v282_v4  ;;  %v356_v24 = vadd.f32 %v409_v22, %v355_v23 }
 0x142   :  { %v299_v17 = vpop.permute.xlu1 %298 }
 0x143   :  { %v301_v18 = vmax.f32 %v296_v16, %v299_v17 }
 0x145   :  { %v305_v19 = vmax.f32 %v301_v18, %v303_v14 }
 0x147   :  { %v309_v21 = vmax.f32 %v305_v19, %v307_v20 }
 0x149   :  { %398 = vmatmul.msk.f32.vlgmr.msrb.gmra.mxu3 %vm334_vm0, %v309_v21 }
 0x1cc   :  { %v375_v25 = vpop.f32.mrf.mxu3 }
 0x1cd   :  { %v376_v26 = vadd.f32 %v375_v25, %v356_v24 }
 0x1cf   :  { %v378_v27 = vmax.f32 %v376_v26, 0.0 }
 0x1d1   :  { %379 = vst [vmem:[#allocation7] sm:$0x3] %v378_v27 }
 0x1d2   :  { %390 = dma.vmem_to_hbm [thread:$0]  %s386_s10, 32, %s388_s13, [#allocation4]  }
 0x1d3   :  { %486 = dma.done.wait [#allocation4], 32  }
 0x1d4   :  { %487 = vsyncadd [#allocation4], 4294967264 }
 0x1d5   :  { %395 = vsyncpa [#allocation3], 1 }
 0x1d6   :  { %396 = vsyncpa [#allocation6], 1 }
 0x1d7   :  { %397 = vsyncpa [#allocation4], 1 }

</bundles_post_ra>
